<compile_context>
chip_gen: v5e
topology: v5e:2x2
jax: 0.10.0
libtpu: 0.0.40
codegen_flags: <defaults>
</compile_context>

<pallas_src>
import math

import jax
import jax.numpy as jnp
from jax.experimental import pallas as pl
from jax.experimental.pallas import tpu as pltpu


# ----------------------------------------------------------------------------
# Exact (erf) GELU.  nn.GELU() default uses the erf formulation.  lax.erf's
# Mosaic lowering is not guaranteed, so we use the Eigen/XLA single-precision
# rational approximation (mul/add/clamp + one divide, ~4e-6 abs error).  The
# divide can be routed to the EUP via pl.reciprocal inside kernels.
# ----------------------------------------------------------------------------
_ERF_ALPHA = (-2.72614225801306e-10, 2.77068142495902e-08, -2.10102402082508e-06,
              -5.69250639462346e-05, -7.34990630326855e-04, -2.95459980854025e-03,
              -1.60960333262415e-02)
_ERF_BETA = (-1.45660718464996e-05, -2.13374055278905e-04, -1.68282697438203e-03,
             -7.37332916720468e-03, -1.42647390514189e-02)


def _erf_f32(x, recip=None):
    xc = jnp.clip(x, -4.0, 4.0)
    x2 = xc * xc
    p = jnp.full_like(x2, _ERF_ALPHA[0])
    for c in _ERF_ALPHA[1:]:
        p = p * x2 + c
    q = jnp.full_like(x2, _ERF_BETA[0])
    for c in _ERF_BETA[1:]:
        q = q * x2 + c
    if recip is None:
        return xc * p / q
    return xc * p * recip(q)        # divide -> EUP (free slot in the GELU chain)


def _gelu_exact(x, recip=None):
    return 0.5 * x * (1.0 + _erf_f32(x * (1.0 / math.sqrt(2.0)), recip))


def _kernel_recip(q):
    # approx reciprocal (EUP vrcp); adds <~2e-4 relative error to erf, far
    # below the bf16 error budget of the surrounding kernel.
    return pl.reciprocal(q, approx=True)


# ----------------------------------------------------------------------------
# Sizing helpers (VMEM budget + L-tile selection).
# ----------------------------------------------------------------------------
def _next_pow2(n: int) -> int:
    return 1 << (int(n) - 1).bit_length()


def _vmem_limit_bytes() -> int:
    """Scoped-VMEM budget: ~75% of physical, capped at 100 MiB.
    -> ~96 MiB on 128-MiB v5e/v6e, ~48 MiB on 64-MiB v7x."""
    cap = 64 * 1024 * 1024
    try:
        cap = int(getattr(pltpu.get_tpu_info(), "vmem_capacity_bytes", cap))
    except Exception:
        pass
    return int(min(cap * 3 // 4, 100 * 1024 * 1024))


_TILE_CANDIDATES = (4096, 2048, 1024, 512, 256, 128)


def _pick_l_tile(L, bytes_per_lane, budget_bytes):
    budget_bytes = max(int(budget_bytes), 0)
    for t in _TILE_CANDIDATES:
        if L % t == 0 and t * bytes_per_lane <= budget_bytes:
            return t
    # TODO(synk): for huge non-128-multiple L this falls back to an untiled
    # block that may not fit VMEM; such L should be padded by the caller.
    return L


# ----------------------------------------------------------------------------
# Kernel 1: SSM convolution-kernel generation (S4DKernel.forward), L-tiled.
# ----------------------------------------------------------------------------
def _kgen_kernel(ct_r_ref, ct_i_ref, er_ref, ei_ref, k_ref):
    """k[:, t*TL:(t+1)*TL] = sum_n ct_r[t,n,:,0]*er[n,:,:] + ct_i[t,n,:,0]*ei[n,:,:].

    er/ei hold Re/Im of exp(dtA*j) for the BASE tile j < TL only; they are
    constant-index-map inputs (fetched once, resident for the whole grid).
    The per-tile decay/phase exp(dtA*t*TL), the 2*Re(...) expansion and its
    sign are folded into ct_r/ct_i by the wrapper, so every grid step is pure
    VPU mul/add with the N2 reduction on the leading (non-layout) axis, and
    the L-tile axis can run 'parallel' (2-TC sharding on v7x).
    """
    t = pl.program_id(0)
    cr = ct_r_ref[t]                    # (N2, H, 1)
    ci = ct_i_ref[t]                    # (N2, H, 1)
    k_ref[...] = jnp.sum(cr * er_ref[...] + ci * ei_ref[...], axis=0)


def s4d_ssm_kernel(log_dt, C_real, C_imag, log_A_real, A_imag, L, l_tile=None):
    """S4DKernel.forward(L) -> (H, L) float32."""
    H, N2 = log_A_real.shape
    f32 = jnp.float32
    vmem_limit = _vmem_limit_bytes()

    if l_tile is None:
        # er/ei residents are (N2, H, TL) f32 each and (like every BlockSpec
        # input) may be double-buffered; budget them + the output block into
        # half of the scoped-VMEM limit (re-derived per part, incl. v7x 64 MiB).
        bytes_per_lane = (2 * 2 * N2 * H + 2 * H) * 4
        tl = _pick_l_tile(L, bytes_per_lane, vmem_limit // 2)
    else:
        tl = l_tile
    assert L % tl == 0
    n_tiles = L // tl

    # Parameter-side complex math stays in plain JAX (KB-sized tensors;
    # Pallas TPU has no complex dtype).
    dt = jnp.exp(log_dt).astype(f32)                               # (H,)
    A = -jnp.exp(log_A_real) + 1j * A_imag                         # (H, N2) c64
    dtA = A * dt[:, None]
    Cp = (C_real + 1j * C_imag) * (jnp.exp(dtA) - 1.0) / A         # (H, N2)

    # Base tile e[n, h, j] = exp(dtA[h, n] * j), j in [0, TL): the ONLY
    # transcendental work proportional to the tile size, done once in XLA.
    j = jnp.arange(tl, dtype=f32)
    ar = jnp.real(dtA).astype(f32).T[:, :, None]                   # (N2, H, 1)
    ai = jnp.imag(dtA).astype(f32).T[:, :, None]
    mag = jnp.exp(ar * j)
    er = (mag * jnp.cos(ai * j)).astype(f32)                       # (N2, H, TL)
    ei = (mag * jnp.sin(ai * j)).astype(f32)

    # Per-tile coefficients Ct = C' * exp(dtA * t*TL); fold in the factor 2
    # and the minus sign of the imaginary part (saves one (H,TL) VPU mul/tile).
    starts = (jnp.arange(n_tiles, dtype=f32) * tl)[:, None, None]  # (T,1,1)
    Ct = Cp[None] * jnp.exp(dtA[None] * starts)                    # (T, H, N2)
    Ct = jnp.swapaxes(Ct, 1, 2)                                    # (T, N2, H)
    ct_r = (2.0 * jnp.real(Ct)).astype(f32)[..., None]             # (T, N2, H, 1)
    ct_i = (-2.0 * jnp.imag(Ct)).astype(f32)[..., None]
    # NOTE: the (..., 1) trailing dim pads to 128 lanes in VMEM; it is KB-MB
    # sized at realistic H*N2*T and fetched exactly once (constant index map).

    return pl.pallas_call(
        _kgen_kernel,
        out_shape=jax.ShapeDtypeStruct((H, L), f32),
        grid=(n_tiles,),
        in_specs=[
            pl.BlockSpec((n_tiles, N2, H, 1), lambda t: (0, 0, 0, 0)),  # ct_r
            pl.BlockSpec((n_tiles, N2, H, 1), lambda t: (0, 0, 0, 0)),  # ct_i
            pl.BlockSpec((N2, H, tl), lambda t: (0, 0, 0)),             # er
            pl.BlockSpec((N2, H, tl), lambda t: (0, 0, 0)),             # ei
        ],
        out_specs=pl.BlockSpec((H, tl), lambda t: (0, t)),
        compiler_params=pltpu.CompilerParams(
            dimension_semantics=("parallel",),
            vmem_limit_bytes=vmem_limit),
    )(ct_r, ct_i, er, ei)


# ----------------------------------------------------------------------------
# Kernel 2: fused epilogue — D skip + GELU + 1x1 Conv1d + GLU.
# ----------------------------------------------------------------------------
def _fused_kernel_mxu(u_ref, conv_ref, d_ref, w_ref, bias_ref, o_ref):
    """1x1 conv as ONE bf16 MXU matmul (f32 accumulate), lane-dense (2H, TL)
    result, single wide store.  conv arrives bf16 (HBM-bound input); all
    elementwise math stays f32 (no bf16 VPU/EUP on v5e)."""
    u = u_ref[...]                                         # (H, TL) f32
    y = conv_ref[...].astype(jnp.float32) + u * d_ref[...]
    y = _gelu_exact(y, recip=_kernel_recip)
    z = jnp.dot(w_ref[...], y.astype(jnp.bfloat16),
                preferred_element_type=jnp.float32) + bias_ref[...]
    h = u.shape[0]
    o_ref[...] = z[:h, :] * jax.nn.sigmoid(z[h:, :])


def _fused_kernel_vpu(u_ref, conv_ref, d_ref, w_ref, bias_ref, o_ref):
    """Small-H variant: with K=H and M=2H below ~128 the MXU would be mostly
    padding, so the 1x1 conv runs as H unrolled f32 VPU FMAs instead.
    w_ref is (H, 2H, 1): row h is the (2H,1) column of the weight matrix."""
    u = u_ref[...]                                         # (H, TL) f32
    y = conv_ref[...].astype(jnp.float32) + u * d_ref[...]
    y = _gelu_exact(y, recip=_kernel_recip)
    h, tl = u.shape
    z = jnp.broadcast_to(bias_ref[...], (2 * h, tl))
    for i in range(h):                                     # static unroll, small H
        z = z + w_ref[i] * y[i:i + 1, :]                   # (2H,1)*(1,TL)
    o_ref[...] = z[:h, :] * jax.nn.sigmoid(z[h:, :])


def s4d_forward(u, params, l_tile=None):
    """S4D.forward (transposed=True, dropout=0).  u: (B, H, L) f32 -> (y, None)."""
    B, H, L = u.shape
    u = u.astype(jnp.float32)
    vmem_limit = _vmem_limit_bytes()

    # --- 1) SSM convolution kernel k(H, L)  (Pallas) ---
    k = s4d_ssm_kernel(params["log_dt"], params["C_real"], params["C_imag"],
                       params["log_A_real"], params["A_imag"], L, l_tile)

    # --- 2) causal convolution via FFT (XLA's native TPU FFT) ---
    # Pad to the next power of two (>= 2L-1): non-pow2 TPU FFTs fall back to
    # Bluestein and are several times slower; any n >= 2L-1 preserves the
    # linear-convolution identity, so this matches the module's rfft(n=2L).
    nfft = _next_pow2(2 * L - 1)
    k_f = jnp.fft.rfft(k, n=nfft)
    u_f = jnp.fft.rfft(u, n=nfft)
    conv = jnp.fft.irfft(u_f * k_f, n=nfft)[..., :L]
    # The epilogue is HBM-bound (~H/3 flop/byte << MXU/HBM balance), so cross
    # its HBM boundary in bf16 where it is free: this cast fuses into the
    # [..., :L] slice above.  `u` stays f32 (a standalone cast would add an
    # HBM pass) and the output stays f32 (module output dtype).
    conv = conv.astype(jnp.bfloat16)

    # --- 3) fused epilogue: D skip + GELU + 1x1 conv + GLU (Pallas) ---
    d = params["D"].reshape(H, 1).astype(jnp.float32)
    bias = params["conv_b"].reshape(2 * H, 1).astype(jnp.float32)
    w2 = params["conv_w"].reshape(2 * H, H).astype(jnp.float32)

    use_mxu = H >= 128
    if use_mxu:
        kernel = _fused_kernel_mxu
        w_in = w2.astype(jnp.bfloat16)                               # (2H, H) bf16
        w_spec = pl.BlockSpec((2 * H, H), lambda b, t: (0, 0))
        w_bytes = 2 * H * H * 2
    else:
        kernel = _fused_kernel_vpu
        w_in = jnp.swapaxes(w2, 0, 1)[..., None]                     # (H, 2H, 1) f32
        w_spec = pl.BlockSpec((H, 2 * H, 1), lambda b, t: (0, 0, 0))
        w_bytes = 2 * H * H * 4

    if l_tile is None:
        # double-buffered u (f32) + conv (bf16) + out (f32) blocks per lane,
        # leaving headroom for the (double-buffered) resident weights.
        bytes_per_lane = 2 * (4 * H + 2 * H + 4 * H)
        tl = _pick_l_tile(L, bytes_per_lane, vmem_limit // 2 - 2 * w_bytes)
    else:
        tl = l_tile
    assert L % tl == 0
    n_tiles = L // tl

    y = pl.pallas_call(
        kernel,
        out_shape=jax.ShapeDtypeStruct((B, H, L), jnp.float32),
        grid=(B, n_tiles),
        in_specs=[
            pl.BlockSpec((None, H, tl), lambda b, t: (b, 0, t)),     # u    (f32)
            pl.BlockSpec((None, H, tl), lambda b, t: (b, 0, t)),     # conv (bf16)
            pl.BlockSpec((H, 1), lambda b, t: (0, 0)),               # D
            w_spec,                                                  # 1x1-conv W
            pl.BlockSpec((2 * H, 1), lambda b, t: (0, 0)),           # bias
        ],
        out_specs=pl.BlockSpec((None, H, tl), lambda b, t: (b, 0, t)),
        compiler_params=pltpu.CompilerParams(
            dimension_semantics=("parallel", "parallel"),
            vmem_limit_bytes=vmem_limit),
    )(u, conv, d, w_in, bias)
    return y, None


# ----------------------------------------------------------------------------
# Pure-JAX reference (mirrors the PyTorch code, FFT path) for sanity checks.
# ----------------------------------------------------------------------------
def s4d_kernel_reference(params, L):
    dt = jnp.exp(params["log_dt"])
    C = params["C_real"] + 1j * params["C_imag"]
    A = -jnp.exp(params["log_A_real"]) + 1j * params["A_imag"]
    dtA = A * dt[:, None]
    K = dtA[..., None] * jnp.arange(L)
    Cp = C * (jnp.exp(dtA) - 1.0) / A
    return 2.0 * jnp.einsum("hn,hnl->hl", Cp, jnp.exp(K),
                            precision=jax.lax.Precision.HIGHEST).real


def s4d_reference(u, params):
    B, H, L = u.shape
    k = s4d_kernel_reference(params, L)
    k_f = jnp.fft.rfft(k, n=2 * L)
    u_f = jnp.fft.rfft(u, n=2 * L)
    y = jnp.fft.irfft(u_f * k_f, n=2 * L)[..., :L]
    y = y + u * params["D"][:, None]
    y = jax.nn.gelu(y, approximate=False)
    w = params["conv_w"].reshape(2 * H, H)
    z = jnp.einsum("ch,bhl->bcl", w, y,
                   precision=jax.lax.Precision.HIGHEST) + params["conv_b"][None, :, None]
    return z[:, :H] * jax.nn.sigmoid(z[:, H:])


def _make_params(key, H, N2):
    dt_min, dt_max = 1e-4, 0.1
    ks = jax.random.split(key, 6)
    return {
        # S4DKernel params (cfr = cfi = 1)
        "log_dt": jax.random.uniform(ks[0], (H,), jnp.float32)
                  * (math.log(dt_max) - math.log(dt_min)) + math.log(dt_min),
        "C_real": jax.random.normal(ks[1], (H, N2), jnp.float32) / jnp.sqrt(2.0),
        "C_imag": jax.random.normal(ks[2], (H, N2), jnp.float32) / jnp.sqrt(2.0),
        "log_A_real": jnp.log(0.5 * jnp.ones((H, N2), jnp.float32)),
        "A_imag": math.pi * jnp.broadcast_to(
            jnp.arange(N2, dtype=jnp.float32), (H, N2)),
        # S4D params
        "D": jax.random.normal(ks[3], (H,), jnp.float32),
        "conv_w": jax.random.normal(ks[4], (2 * H, H, 1), jnp.float32) / math.sqrt(H),
        "conv_b": jax.random.normal(ks[5], (2 * H,), jnp.float32) * 0.1,
    }


if __name__ == "__main__":
    key = jax.random.PRNGKey(0)

    # Tight standalone check of the erf rational vs the exact erf (review):
    xs = jnp.linspace(-6.0, 6.0, 1001, dtype=jnp.float32)
    erf_err = float(jnp.max(jnp.abs(_erf_f32(xs) - jax.lax.erf(xs))))
    assert erf_err < 1e-5, f"erf approximation error {erf_err}"

    # (B, H, N, L, l_tile, atol, rtol)
    #   1) tiny single-tile shapes (VPU epilogue path)
    #   2) forced multi-tile path (grid, per-tile coefficient indexing)
    #   3) H=128: exercises the bf16 MXU epilogue path (bf16-sized tolerance)
    cases = [
        (2, 8, 16, 16, None, 1e-2, 2e-2),
        (2, 8, 16, 256, 128, 1e-2, 2e-2),
        (2, 128, 16, 256, None, 2e-2, 3e-2),
    ]
    for (B, H, N, L, lt, atol, rtol) in cases:
        key, kp, ku = jax.random.split(key, 3)
        params = _make_params(kp, H, N // 2)
        u = jax.random.normal(ku, (B, H, L), jnp.float32)

        # Kernel 1 vs reference (all f32; tolerance bounded by f32 phase
        # rounding, which the PyTorch cfloat original shares).
        k = jax.block_until_ready(
            s4d_ssm_kernel(params["log_dt"], params["C_real"], params["C_imag"],
                           params["log_A_real"], params["A_imag"], L, lt))
        k_ref = s4d_kernel_reference(params, L)
        assert bool(jnp.all(jnp.abs(k - k_ref) <= 2e-3 + 2e-3 * jnp.abs(k_ref))), (
            f"(H={H},L={L}) SSM kernel mismatch: "
            f"{float(jnp.max(jnp.abs(k - k_ref)))}")

        # End-to-end forward.
        y, _ = s4d_forward(u, params, l_tile=lt)
        y = jax.block_until_ready(y)
        assert y.shape == (B, H, L) and y.dtype == jnp.float32, (y.shape, y.dtype)

        y_ref = s4d_reference(u, params)
        ok = bool(jnp.all(jnp.abs(y - y_ref) <= atol + rtol * jnp.abs(y_ref)))
        assert ok, (f"(B={B},H={H},L={L}) max abs err "
                    f"{float(jnp.max(jnp.abs(y - y_ref)))}")

    print("KERNEL_OK")
</pallas_src>

<mosaic_0001>
module attributes {stable_mosaic.version = 11 : i64} {
  func.func @_kgen_kernel(%arg0: i32, %arg1: memref<1x8x8x1xf32, #tpu.memory_space<vmem>>, %arg2: memref<1x8x8x1xf32, #tpu.memory_space<vmem>>, %arg3: memref<8x8x16xf32, #tpu.memory_space<vmem>>, %arg4: memref<8x8x16xf32, #tpu.memory_space<vmem>>, %arg5: memref<8x16xf32, #tpu.memory_space<vmem>>) attributes {dimension_semantics = [#tpu.dimension_semantics<parallel>], iteration_bounds = array<i64: 1>, scalar_prefetch = 0 : i64, scratch_operands = 0 : i64, tpu.core_type = #tpu.core_type<tc>, window_params = [{pipeline_mode = #tpu.pipeline_mode<synchronous>, transform_indices = @transform_0, window_bounds = array<i64: 1, 8, 8, 1>}, {pipeline_mode = #tpu.pipeline_mode<synchronous>, transform_indices = @transform_1, window_bounds = array<i64: 1, 8, 8, 1>}, {pipeline_mode = #tpu.pipeline_mode<synchronous>, transform_indices = @transform_2, window_bounds = array<i64: 8, 8, 16>}, {pipeline_mode = #tpu.pipeline_mode<synchronous>, transform_indices = @transform_3, window_bounds = array<i64: 8, 8, 16>}, {transform_indices = @transform_4, window_bounds = array<i64: 8, 16>}]} {
    %0 = arith.index_cast %arg0 : i32 to index
    %c0 = arith.constant 0 : index
    %c0_0 = arith.constant 0 : index
    %c0_1 = arith.constant 0 : index
    %1 = vector.load %arg1[%0, %c0, %c0_0, %c0_1] : memref<1x8x8x1xf32, #tpu.memory_space<vmem>>, vector<1x8x8x1xf32>
    %2 = vector.shape_cast %1 : vector<1x8x8x1xf32> to vector<8x8x1xf32>
    %3 = arith.index_cast %arg0 : i32 to index
    %c0_2 = arith.constant 0 : index
    %c0_3 = arith.constant 0 : index
    %c0_4 = arith.constant 0 : index
    %4 = vector.load %arg2[%3, %c0_2, %c0_3, %c0_4] : memref<1x8x8x1xf32, #tpu.memory_space<vmem>>, vector<1x8x8x1xf32>
    %5 = vector.shape_cast %4 : vector<1x8x8x1xf32> to vector<8x8x1xf32>
    %c0_5 = arith.constant 0 : index
    %c0_6 = arith.constant 0 : index
    %c0_7 = arith.constant 0 : index
    %6 = vector.load %arg3[%c0_5, %c0_6, %c0_7] : memref<8x8x16xf32, #tpu.memory_space<vmem>>, vector<8x8x16xf32>
    %7 = vector.broadcast %2 : vector<8x8x1xf32> to vector<8x8x16xf32>
    %8 = arith.mulf %7, %6 : vector<8x8x16xf32>
    %c0_8 = arith.constant 0 : index
    %c0_9 = arith.constant 0 : index
    %c0_10 = arith.constant 0 : index
    %9 = vector.load %arg4[%c0_8, %c0_9, %c0_10] : memref<8x8x16xf32, #tpu.memory_space<vmem>>, vector<8x8x16xf32>
    %10 = vector.broadcast %5 : vector<8x8x1xf32> to vector<8x8x16xf32>
    %11 = arith.mulf %10, %9 : vector<8x8x16xf32>
    %12 = arith.addf %8, %11 : vector<8x8x16xf32>
    %cst = arith.constant dense<0.000000e+00> : vector<8x16xf32>
    %13 = vector.multi_reduction <add>, %12, %cst [0] : vector<8x8x16xf32> to vector<8x16xf32>
    %c0_11 = arith.constant 0 : index
    %c0_12 = arith.constant 0 : index
    %14 = vector.load %arg5[%c0_11, %c0_12] : memref<8x16xf32, #tpu.memory_space<vmem>>, vector<8x16xf32>
    tpu.vector_store %arg5[%c0_11, %c0_12], %13 {strides = array<i32>} : memref<8x16xf32, #tpu.memory_space<vmem>>, vector<8x16xf32>,
    return
  }
  func.func @transform_0(%arg0: i32) -> (i32, i32, i32, i32) {
    %c0_i32 = arith.constant 0 : i32
    %c0_i32_0 = arith.constant 0 : i32
    %c0_i32_1 = arith.constant 0 : i32
    %c0_i32_2 = arith.constant 0 : i32
    %c0_i32_3 = arith.constant 0 : i32
    return %c0_i32, %c0_i32_0, %c0_i32_1, %c0_i32_2 : i32, i32, i32, i32
  }
  func.func @transform_1(%arg0: i32) -> (i32, i32, i32, i32) {
    %c0_i32 = arith.constant 0 : i32
    %c0_i32_0 = arith.constant 0 : i32
    %c0_i32_1 = arith.constant 0 : i32
    %c0_i32_2 = arith.constant 0 : i32
    %c0_i32_3 = arith.constant 0 : i32
    return %c0_i32, %c0_i32_0, %c0_i32_1, %c0_i32_2 : i32, i32, i32, i32
  }
  func.func @transform_2(%arg0: i32) -> (i32, i32, i32) {
    %c0_i32 = arith.constant 0 : i32
    %c0_i32_0 = arith.constant 0 : i32
    %c0_i32_1 = arith.constant 0 : i32
    %c0_i32_2 = arith.constant 0 : i32
    return %c0_i32, %c0_i32_0, %c0_i32_1 : i32, i32, i32
  }
  func.func @transform_3(%arg0: i32) -> (i32, i32, i32) {
    %c0_i32 = arith.constant 0 : i32
    %c0_i32_0 = arith.constant 0 : i32
    %c0_i32_1 = arith.constant 0 : i32
    %c0_i32_2 = arith.constant 0 : i32
    return %c0_i32, %c0_i32_0, %c0_i32_1 : i32, i32, i32
  }
  func.func @transform_4(%arg0: i32) -> (i32, i32) {
    %c0_i32 = arith.constant 0 : i32
    %c0_i32_0 = arith.constant 0 : i32
    return %c0_i32, %arg0 : i32, i32
  }
}

</mosaic_0001>

<bundles_post_ra>
// kernel: tpu_custom_call.1
= control target key start
LH: loop header
LB: loop body
LE: loop exit
PB: predicated region body
PF: predicated region fallthrough
CT: control target
= control target key end

     0   :  { %v221_v3 = vmov 0   ;;  %s356_s0 = inlined_call_operand.vmem [shape: f32[1,8,8,1], index: 0, kind: input, shape index: {}]   ;;  %s357_s1 = inlined_call_operand.vmem [shape: f32[1,8,8,1], index: 1, kind: input, shape index: {}]   ;;  %s358_s2 = inlined_call_operand.vmem [shape: f32[8,8,16], index: 2, kind: input, shape index: {}]   ;;  %s359_s3 = inlined_call_operand.vmem [shape: f32[8,8,16], index: 3, kind: input, shape index: {}]   ;;  %s360_s4 = inlined_call_operand.hbm [shape: f32[8,16], index: 4, kind: output, shape index: {}]  }
   0x1   :  { %v24_v0 = vld [vmem:[%s356_s0 + $0x20] sm:$0xff]  ;;  %v22_v1 = vld [vmem:[%s356_s0 + $0x10] sm:$0xff]  ;;  %194 = vset.pattern.permute.xlu2 %v221_v3  ;;  %193 = vset.pattern.permute.xlu1 %v221_v3 }
   0x2   :  { %v20_v2 = vld [vmem:[%s356_s0] sm:$0xff]  ;;  %192 = vset.pattern.permute.xlu0 %v221_v3  ;;  %67 = vperm.xlu2 %194, %v24_v0  }
   0x3   :  { %57 = vperm.xlu1 %193, %v22_v1   ;;  %47 = vperm.xlu0 %192, %v20_v2  }
   0x4   :  { %9 = vsyncpa [#allocation3], 0  ;;  %v25_v4 = vld [vmem:[%s356_s0 + $0x28] sm:$0xff]  ;;  %v23_v5 = vld [vmem:[%s356_s0 + $0x18] sm:$0xff]  ;;  %vm157_vm0 = vcmask 130048   ;;  %s222_s24 = smov [#allocation2]  }
   0x5   :  { %v21_v6 = vld [vmem:[%s356_s0 + $0x8] sm:$0xff]  ;;  %v29_v8 = vld [vmem:[%s357_s1] sm:$0xff]  ;;  %v26_v9 = vld [vmem:[%s356_s0 + $0x30] sm:$0xff]  ;;  %s179_s25 = sshll.u32 %s222_s24, 4  ;;  %s180_s25 = int_to_ptr.vmem [resolvable:$true] %s179_s25 }
   0x6   :  { %v30_v7 = vld [vmem:[%s357_s1 + $0x8] sm:$0xff]  ;;  %v33_v10 = vld [vmem:[%s357_s1 + $0x20] sm:$0xff]  ;;  %v32_v11 = vld [vmem:[%s357_s1 + $0x18] sm:$0xff] }
   0x7   :  { %v31_v12 = vld [vmem:[%s357_s1 + $0x10] sm:$0xff]  ;;  %v27_v13 = vld [vmem:[%s356_s0 + $0x38] sm:$0xff]  ;;  %v34_v15 = vld [vmem:[%s357_s1 + $0x28] sm:$0xff] }
   0x8   :  { %v35_v14 = vld [vmem:[%s357_s1 + $0x30] sm:$0xff]  ;;  %v36_v16 = vld [vmem:[%s357_s1 + $0x38] sm:$0xff]  ;;  %v93_v23 = vld [vmem:[%s359_s3] sm:$0xff] }
   0x9   :  { %v94_v24 = vld [vmem:[%s359_s3 + $0x8] sm:$0xff]  ;;  %v37_v25 = vld [vmem:[%s358_s2] sm:$0xff]  ;;  %v39_v35 = vld [vmem:[%s358_s2 + $0x10] sm:$0xff] }
   0xa   :  { %72 = vperm.xlu2 %194, %v25_v4   ;;  %v38_v26 = vld [vmem:[%s358_s2 + $0x8] sm:$0xff]  ;;  %v96_v36 = vld [vmem:[%s359_s3 + $0x18] sm:$0xff]  ;;  %v95_v37 = vld [vmem:[%s359_s3 + $0x10] sm:$0xff] }
   0xb   :  { %62 = vperm.xlu1 %193, %v23_v5   ;;  %52 = vperm.xlu0 %192, %v21_v6   ;;  %v40_v39 = vld [vmem:[%s358_s2 + $0x18] sm:$0xff]  ;;  %v41_v46 = vld [vmem:[%s358_s2 + $0x20] sm:$0xff]  ;;  %v42_v57 = vld [vmem:[%s358_s2 + $0x28] sm:$0xff] }
   0xc   :  { %v97_v47 = vld [vmem:[%s359_s3 + $0x20] sm:$0xff]  ;;  %v98_v59 = vld [vmem:[%s359_s3 + $0x28] sm:$0xff]  ;;  %v99_v60 = vld [vmem:[%s359_s3 + $0x30] sm:$0xff] }
   0xd   :  { %v43_v3 = vld [vmem:[%s358_s2 + $0x30] sm:$0xff] }
  0x12   :  { %108 = vperm.xlu2 %194, %v30_v7  }
  0x13   :  { %103 = vperm.xlu1 %193, %v29_v8   ;;  %77 = vperm.xlu0 %192, %v26_v9  }
  0x1a   :  { %123 = vperm.xlu2 %194, %v33_v10   ;;  %v44_v10 = vld [vmem:[%s358_s2 + $0x38] sm:$0xff]  ;;  %s181_s2 = sshll.u32 %s360_s4, 4  ;;  %s182_s2 = int_to_ptr.hbm [resolvable:$true] %s181_s2 }
  0x1b   :  { %118 = vperm.xlu1 %193, %v32_v11   ;;  %113 = vperm.xlu0 %192, %v31_v12  }
  0x22   :  { %82 = vperm.xlu2 %194, %v27_v13   ;;  %v100_v13 = vld [vmem:[%s359_s3 + $0x38] sm:$0xff] }
  0x23   :  { %133 = vperm.xlu1 %193, %v35_v14   ;;  %128 = vperm.xlu0 %192, %v34_v15  }
  0x2b   :  { %138 = vperm.xlu0 %192, %v36_v16  }
  0x5c   :  { %v68_v17 = vpop.permute.xlu2 %67 }
  0x5d   :  { %v89_v53 = vmul.f32 %v68_v17, %v41_v46 }
  0x64   :  { %v73_v20 = vpop.permute.xlu2 %72 }
  0x65   :  { %v90_v63 = vmul.f32 %v73_v20, %v42_v57 }
  0x6c   :  { %v109_v30 = vpop.permute.xlu2 %108 }
  0x6d   :  { %v142_v31 = vmul.f32 %v109_v30, %v94_v24 }
  0x74   :  { %v124_v51 = vpop.permute.xlu2 %123 }
  0x75   :  { %v58_v18 = vpop.permute.xlu1 %57  ;;  %v48_v19 = vpop.permute.xlu0 %47  ;;  %v145_v54 = vmul.f32 %v124_v51, %v97_v47 }
  0x76   :  { %v85_v32 = vmul.f32 %v48_v19, %v37_v25  ;;  %v87_v42 = vmul.f32 %v58_v18, %v39_v35 }
  0x77   :  { %v153_v0 = vadd.f32 %v145_v54, %v89_v53 }
  0x79   :  { %v165_v7 = vsel %vm157_vm0, %v153_v0, 0.0 }
  0x7c   :  { %v83_v11 = vpop.permute.xlu2 %82 }
  0x7d   :  { %v63_v21 = vpop.permute.xlu1 %62  ;;  %v53_v22 = vpop.permute.xlu0 %52  ;;  %v92_v17 = vmul.f32 %v83_v11, %v44_v10 }
  0x7e   :  { %v86_v33 = vmul.f32 %v53_v22, %v38_v26  ;;  %v88_v48 = vmul.f32 %v63_v21, %v40_v39 }
  0x80   :  { %v150_v38 = vadd.f32 %v142_v31, %v86_v33 }
  0x82   :  { %v159_v49 = vsel %vm157_vm0, %v150_v38, 0.0 }
  0x85   :  { %v104_v27 = vpop.permute.xlu1 %103  ;;  %v78_v28 = vpop.permute.xlu0 %77 }
  0x86   :  { %v141_v29 = vmul.f32 %v104_v27, %v93_v23  ;;  %v91_v8 = vmul.f32 %v78_v28, %v43_v3 }
  0x88   :  { %v149_v34 = vadd.f32 %v141_v29, %v85_v32 }
  0x8a   :  { %v158_v43 = vsel %vm157_vm0, %v149_v34, 0.0 }
  0x8b   :  { %v160_v52 = vadd.f32 %v159_v49, %v158_v43 }
  0x8d   :  { %v119_v40 = vpop.permute.xlu1 %118  ;;  %v114_v41 = vpop.permute.xlu0 %113 }
  0x8e   :  { %v144_v44 = vmul.f32 %v119_v40, %v96_v36  ;;  %v143_v45 = vmul.f32 %v114_v41, %v95_v37 }
  0x90   :  { %v151_v50 = vadd.f32 %v143_v45, %v87_v42  ;;  %v152_v55 = vadd.f32 %v144_v44, %v88_v48 }
  0x92   :  { %v161_v56 = vsel %vm157_vm0, %v151_v50, 0.0  ;;  %v163_v1 = vsel %vm157_vm0, %v152_v55, 0.0 }
  0x93   :  { %v162_v58 = vadd.f32 %v161_v56, %v160_v52 }
  0x95   :  { %v134_v61 = vpop.permute.xlu1 %133  ;;  %v129_v62 = vpop.permute.xlu0 %128  ;;  %v164_v4 = vadd.f32 %v163_v1, %v162_v58 }
  0x96   :  { %v146_v2 = vmul.f32 %v129_v62, %v98_v59  ;;  %v147_v5 = vmul.f32 %v134_v61, %v99_v60 }
  0x97   :  { %v166_v12 = vadd.f32 %v165_v7, %v164_v4 }
  0x98   :  { %v154_v6 = vadd.f32 %v146_v2, %v90_v63  ;;  %v155_v14 = vadd.f32 %v147_v5, %v91_v8 }
  0x9a   :  { %v167_v9 = vsel %vm157_vm0, %v154_v6, 0.0  ;;  %v169_v19 = vsel %vm157_vm0, %v155_v14, 0.0 }
  0x9b   :  { %v168_v15 = vadd.f32 %v167_v9, %v166_v12 }
  0x9d   :  { %v139_v16 = vpop.permute.xlu0 %138  ;;  %v170_v21 = vadd.f32 %v169_v19, %v168_v15 }
  0x9e   :  { %v148_v18 = vmul.f32 %v139_v16, %v100_v13 }
  0xa0   :  { %v156_v20 = vadd.f32 %v148_v18, %v92_v17 }
  0xa2   :  { %v171_v22 = vsel %vm157_vm0, %v156_v20, 0.0 }
  0xa3   :  { %v172_v23 = vadd.f32 %v171_v22, %v170_v21 }
  0xa5   :  { %173 = vst.msk [vmem:[#allocation2] sm:$0xff] %vm157_vm0, %v172_v23 }
  0xa6   :  { %184 = dma.vmem_to_hbm [thread:$0]  %s180_s25, 128, %s182_s2, [#allocation3]  }
  0xa7   :  { %219 = dma.done.wait [#allocation3], 128  }
  0xa8   :  { %220 = vsyncadd [#allocation3], 4294967168 }
  0xa9   :  { %189 = vsyncpa [#allocation3], 1 }

</bundles_post_ra>
